<compile_context>
chip_gen: v7x
topology: tpu7x:2x2x1
jax: 0.10.0
libtpu: 0.0.40
codegen_flags: <defaults>
</compile_context>

<pallas_src>
import functools

import jax
import jax.numpy as jnp
from jax import lax
from jax.experimental import pallas as pl
from jax.experimental.pallas import tpu as pltpu


def _pick_tile(n):
    """Largest of (512, 256, 128) dividing n, else n (whole axis)."""
    for t in (512, 256, 128):
        if n % t == 0:
            return t
    return n


# ---------------------------------------------------------------------------
# Kernel 1: phi_x / g_x = maxpool2x2(1x1conv(x)), tiled over the pooled axis.
# ---------------------------------------------------------------------------
def _phi_g_kernel(xp_ref, wp_ref, bp_ref, wg_ref, bg_ref, phi_ref, g_ref):
    wp = wp_ref[...]          # (C, Ci)  bf16
    wg = wg_ref[...]          # (C, Ci)  bf16
    bp = bp_ref[...]          # (1, Ci)  f32
    bg = bg_ref[...]          # (1, Ci)  f32

    phi = None
    g = None
    for k in range(4):        # static unroll over the 2x2 window elements
        xk = xp_ref[0, k]     # (tile_s, C) bf16
        ph = jnp.dot(xk, wp, preferred_element_type=jnp.float32) + bp
        gg = jnp.dot(xk, wg, preferred_element_type=jnp.float32) + bg
        phi = ph if phi is None else jnp.maximum(phi, ph)
        g = gg if g is None else jnp.maximum(g, gg)

    phi_ref[0] = phi.astype(phi_ref.dtype)   # bf16 (feeds MXU only in kernel 2)
    g_ref[0] = g.astype(g_ref.dtype)


# ---------------------------------------------------------------------------
# Kernel 2: per (batch, N-tile) attention with Ns blocked as a reduction.
# ---------------------------------------------------------------------------
def _attn_kernel(x_ref, phi_ref, g_ref, wt_ref, bt_ref, ww_ref, bw_ref, out_ref,
                 *, tile_ns):
    x = x_ref[0]                                   # (tile_n, C) f32
    x_bf = x.astype(jnp.bfloat16)

    # theta: 1x1 conv (1/Ns already folded into wt/bt by the wrapper).
    theta = jnp.dot(x_bf, wt_ref[...],
                    preferred_element_type=jnp.float32) + bt_ref[...]   # (tile_n, Ci) f32
    theta_bf = theta.astype(jnp.bfloat16)

    tile_n = theta.shape[0]
    ns = phi_ref.shape[1]
    ci = phi_ref.shape[2]
    ns_chunks = ns // tile_ns                      # static Python int

    def chunk(off):
        phi_c = phi_ref[0, pl.ds(off, tile_ns), :]          # (tile_ns, Ci) bf16
        g_c = g_ref[0, pl.ds(off, tile_ns), :]              # (tile_ns, Ci) bf16
        # f chunk = theta @ phi_c^T   (already includes the 1/Ns scale)
        p = lax.dot_general(theta_bf, phi_c, (((1,), (1,)), ((), ())),
                            preferred_element_type=jnp.float32)          # (tile_n, tile_ns)
        return jnp.dot(p.astype(jnp.bfloat16), g_c,
                       preferred_element_type=jnp.float32)               # (tile_n, Ci)

    if ns_chunks <= 8:
        # static unroll (LLO scheduler visibility)
        y = chunk(0)
        for c in range(1, ns_chunks):
            y = y + chunk(c * tile_ns)
    else:
        y = lax.fori_loop(
            0, ns_chunks,
            lambda c, acc: acc + chunk(pl.multiple_of(c * tile_ns, tile_ns)),
            jnp.zeros((tile_n, ci), jnp.float32))

    # W conv back to C channels (eval BatchNorm folded into ww/bw) + residual, f32.
    w_y = jnp.dot(y.astype(jnp.bfloat16), ww_ref[...],
                  preferred_element_type=jnp.float32) + bw_ref[...]      # (tile_n, C)
    out_ref[0] = (w_y + x).astype(out_ref.dtype)


# ---------------------------------------------------------------------------
# Wrapper
# ---------------------------------------------------------------------------
def nonlocal_block_2d(x_nchw, p):
    B, C, H, W = x_nchw.shape
    assert H % 2 == 0 and W % 2 == 0, "2x2 maxpool assumes even H, W"
    Ci = p["w_theta"].shape[1]
    N = H * W
    Ns = (H // 2) * (W // 2)
    f32, bf16 = jnp.float32, jnp.bfloat16

    # Channels-last activations.  x_flat stays f32 (exact residual); x_pool only feeds
    # the MXU so it is stored bf16 (halves its HBM traffic).
    x_nhwc = jnp.transpose(x_nchw, (0, 2, 3, 1)).astype(f32)              # (B, H, W, C)
    x_flat = x_nhwc.reshape(B, N, C)
    x_pool = jnp.transpose(
        x_nhwc.reshape(B, H // 2, 2, W // 2, 2, C),
        (0, 2, 4, 1, 3, 5)).reshape(B, 4, Ns, C).astype(bf16)             # (B, 4, Ns, C)

    # --- one-time weight folding (pure preprocessing, not input pre-scaling) ---
    inv_ns = 1.0 / Ns
    w_theta = (p["w_theta"] * inv_ns).astype(bf16)       # fold 1/Ns into theta
    b_theta = (p["b_theta"] * inv_ns).astype(f32)
    w_phi = p["w_phi"].astype(bf16)
    b_phi = p["b_phi"].astype(f32)
    w_g = p["w_g"].astype(bf16)
    b_g = p["b_g"].astype(f32)
    w_w = (p["w_w"] * p["bn_scale"]).astype(bf16)        # fold eval BatchNorm into W conv
    b_w = (p["b_w"] * p["bn_scale"] + p["bn_shift"]).astype(f32)

    cparams = pltpu.CompilerParams(
        dimension_semantics=("parallel", "parallel"),
        vmem_limit_bytes=48 * 1024 * 1024)

    # --- kernel 1: phi / g (conv + 2x2 maxpool), tiled over pooled spatial axis ---
    tile_s = _pick_tile(Ns)
    phi_x, g_x = pl.pallas_call(
        _phi_g_kernel,
        out_shape=(jax.ShapeDtypeStruct((B, Ns, Ci), bf16),
                   jax.ShapeDtypeStruct((B, Ns, Ci), bf16)),
        grid=(B, Ns // tile_s),
        in_specs=[pl.BlockSpec((1, 4, tile_s, C), lambda b, s: (b, 0, s, 0)),
                  pl.BlockSpec((C, Ci), lambda b, s: (0, 0)),
                  pl.BlockSpec((1, Ci), lambda b, s: (0, 0)),
                  pl.BlockSpec((C, Ci), lambda b, s: (0, 0)),
                  pl.BlockSpec((1, Ci), lambda b, s: (0, 0))],
        out_specs=(pl.BlockSpec((1, tile_s, Ci), lambda b, s: (b, s, 0)),
                   pl.BlockSpec((1, tile_s, Ci), lambda b, s: (b, s, 0))),
        compiler_params=cparams,
    )(x_pool, w_phi, b_phi, w_g, b_g)

    # --- kernel 2: attention + W conv + residual, tiled over (batch, N-tile) ---
    tile_n = _pick_tile(N)
    tile_ns = _pick_tile(Ns)
    out = pl.pallas_call(
        functools.partial(_attn_kernel, tile_ns=tile_ns),
        out_shape=jax.ShapeDtypeStruct((B, N, C), f32),
        grid=(B, N // tile_n),
        in_specs=[pl.BlockSpec((1, tile_n, C), lambda b, n: (b, n, 0)),
                  # phi/g depend only on the batch index -> no re-DMA across N-tiles
                  pl.BlockSpec((1, Ns, Ci), lambda b, n: (b, 0, 0)),
                  pl.BlockSpec((1, Ns, Ci), lambda b, n: (b, 0, 0)),
                  pl.BlockSpec((C, Ci), lambda b, n: (0, 0)),
                  pl.BlockSpec((1, Ci), lambda b, n: (0, 0)),
                  pl.BlockSpec((Ci, C), lambda b, n: (0, 0)),
                  pl.BlockSpec((1, C), lambda b, n: (0, 0))],
        out_specs=pl.BlockSpec((1, tile_n, C), lambda b, n: (b, n, 0)),
        compiler_params=cparams,
    )(x_flat, phi_x, g_x, w_theta, b_theta, w_w, b_w)

    # back to NCHW like the PyTorch module
    return jnp.transpose(out.reshape(B, H, W, C), (0, 3, 1, 2))


# ---------------------------------------------------------------------------
# Params / reference / test
# ---------------------------------------------------------------------------
def init_params(key, C, *, nontrivial_bn=True):
    Ci = max(C // 2, 1)
    ks = jax.random.split(key, 12)
    s = 0.1
    p = {
        "w_theta": jax.random.normal(ks[0], (C, Ci), jnp.float32) * s,
        "b_theta": jax.random.normal(ks[1], (1, Ci), jnp.float32) * s,
        "w_phi":   jax.random.normal(ks[2], (C, Ci), jnp.float32) * s,
        "b_phi":   jax.random.normal(ks[3], (1, Ci), jnp.float32) * s,
        "w_g":     jax.random.normal(ks[4], (C, Ci), jnp.float32) * s,
        "b_g":     jax.random.normal(ks[5], (1, Ci), jnp.float32) * s,
        "w_w":     jax.random.normal(ks[6], (Ci, C), jnp.float32) * s,
        "b_w":     jax.random.normal(ks[7], (1, C), jnp.float32) * s,
    }
    if nontrivial_bn:
        # Non-trivial eval-mode BatchNorm so the test exercises the attention branch
        # (the module's own init uses gamma=0, which would zero the whole path).
        gamma = 1.0 + 0.5 * jax.random.normal(ks[8], (1, C), jnp.float32)
        beta = 0.1 * jax.random.normal(ks[9], (1, C), jnp.float32)
        mean = 0.1 * jax.random.normal(ks[10], (1, C), jnp.float32)
        var = jnp.exp(0.2 * jax.random.normal(ks[11], (1, C), jnp.float32))
    else:
        gamma = jnp.zeros((1, C), jnp.float32)
        beta = jnp.zeros((1, C), jnp.float32)
        mean = jnp.zeros((1, C), jnp.float32)
        var = jnp.ones((1, C), jnp.float32)
    eps = 1e-5
    scale = gamma / jnp.sqrt(var + eps)
    p["bn_scale"] = scale
    p["bn_shift"] = beta - mean * scale
    return p


def reference(x_nchw, p):
    """Pure-JAX f32 reference mirroring the PyTorch forward exactly."""
    B, C, H, W = x_nchw.shape
    Ci = p["w_theta"].shape[1]

    def conv1x1(x, w, b):
        return jnp.einsum("bchw,cd->bdhw", x, w) + b[0][None, :, None, None]

    def maxpool2(x):
        b_, c_, h_, w_ = x.shape
        return jnp.max(x.reshape(b_, c_, h_ // 2, 2, w_ // 2, 2), axis=(3, 5))

    g_x = maxpool2(conv1x1(x_nchw, p["w_g"], p["b_g"])).reshape(B, Ci, -1)
    g_x = jnp.transpose(g_x, (0, 2, 1))
    theta_x = conv1x1(x_nchw, p["w_theta"], p["b_theta"]).reshape(B, Ci, -1)
    theta_x = jnp.transpose(theta_x, (0, 2, 1))
    phi_x = maxpool2(conv1x1(x_nchw, p["w_phi"], p["b_phi"])).reshape(B, Ci, -1)
    f = jnp.matmul(theta_x, phi_x)
    f_div_c = f / f.shape[-1]
    y = jnp.matmul(f_div_c, g_x)
    y = jnp.transpose(y, (0, 2, 1)).reshape(B, Ci, H, W)
    w_y = conv1x1(y, p["w_w"], p["b_w"])
    w_y = w_y * p["bn_scale"][0][None, :, None, None] + p["bn_shift"][0][None, :, None, None]
    return w_y + x_nchw


if __name__ == "__main__":
    key = jax.random.PRNGKey(0)
    # Small shapes; the larger ones exercise N-tiling and Ns-chunking paths.
    for (B, C, H, W) in [(2, 4, 16, 16), (1, 8, 32, 32), (1, 8, 64, 64)]:
        key, kx, kp = jax.random.split(key, 3)
        x = jax.random.normal(kx, (B, C, H, W), jnp.float32)
        params = init_params(kp, C)

        z = jax.block_until_ready(nonlocal_block_2d(x, params))
        z_ref = reference(x, params)

        assert z.shape == (B, C, H, W)
        # full output (residual-dominated): loose tolerance for bf16 MXU operands
        assert jnp.allclose(z, z_ref, rtol=1e-2, atol=1e-2), f"mismatch at {(B, C, H, W)}"
        # attention branch only (excludes the exact residual): relative-to-max check
        dz, dz_ref = z - x, z_ref - x
        err = float(jnp.max(jnp.abs(dz - dz_ref)))
        scale = float(jnp.max(jnp.abs(dz_ref)))
        assert err <= 0.1 * scale + 1e-4, (err, scale, (B, C, H, W))

    print("KERNEL_OK")
</pallas_src>

<mosaic_0001>
module attributes {stable_mosaic.version = 11 : i64} {
  func.func @_phi_g_kernel(%arg0: i32, %arg1: i32, %arg2: memref<1x4x64x4xbf16, #tpu.memory_space<vmem>>, %arg3: memref<4x2xbf16, #tpu.memory_space<vmem>>, %arg4: memref<1x2xf32, #tpu.memory_space<vmem>>, %arg5: memref<4x2xbf16, #tpu.memory_space<vmem>>, %arg6: memref<1x2xf32, #tpu.memory_space<vmem>>, %arg7: memref<1x64x2xbf16, #tpu.memory_space<vmem>>, %arg8: memref<1x64x2xbf16, #tpu.memory_space<vmem>>) attributes {dimension_semantics = [#tpu.dimension_semantics<parallel>, #tpu.dimension_semantics<parallel>], iteration_bounds = array<i64: 2, 1>, scalar_prefetch = 0 : i64, scratch_operands = 0 : i64, tpu.core_type = #tpu.core_type<tc>, window_params = [{transform_indices = @transform_0, window_bounds = array<i64: 1, 4, 64, 4>}, {pipeline_mode = #tpu.pipeline_mode<synchronous>, transform_indices = @transform_1, window_bounds = array<i64: 4, 2>}, {pipeline_mode = #tpu.pipeline_mode<synchronous>, transform_indices = @transform_2, window_bounds = array<i64: 1, 2>}, {pipeline_mode = #tpu.pipeline_mode<synchronous>, transform_indices = @transform_3, window_bounds = array<i64: 4, 2>}, {pipeline_mode = #tpu.pipeline_mode<synchronous>, transform_indices = @transform_4, window_bounds = array<i64: 1, 2>}, {transform_indices = @transform_5, window_bounds = array<i64: 1, 64, 2>}, {transform_indices = @transform_6, window_bounds = array<i64: 1, 64, 2>}]} {
    %c0 = arith.constant 0 : index
    %c0_0 = arith.constant 0 : index
    %0 = vector.load %arg3[%c0, %c0_0] : memref<4x2xbf16, #tpu.memory_space<vmem>>, vector<4x2xbf16>
    %c0_1 = arith.constant 0 : index
    %c0_2 = arith.constant 0 : index
    %1 = vector.load %arg5[%c0_1, %c0_2] : memref<4x2xbf16, #tpu.memory_space<vmem>>, vector<4x2xbf16>
    %c0_3 = arith.constant 0 : index
    %c0_4 = arith.constant 0 : index
    %2 = vector.load %arg4[%c0_3, %c0_4] : memref<1x2xf32, #tpu.memory_space<vmem>>, vector<1x2xf32>
    %c0_5 = arith.constant 0 : index
    %c0_6 = arith.constant 0 : index
    %3 = vector.load %arg6[%c0_5, %c0_6] : memref<1x2xf32, #tpu.memory_space<vmem>>, vector<1x2xf32>
    %c0_7 = arith.constant 0 : index
    %c0_8 = arith.constant 0 : index
    %c0_9 = arith.constant 0 : index
    %c0_10 = arith.constant 0 : index
    %4 = vector.load %arg2[%c0_7, %c0_8, %c0_9, %c0_10] : memref<1x4x64x4xbf16, #tpu.memory_space<vmem>>, vector<1x1x64x4xbf16>
    %5 = vector.shape_cast %4 : vector<1x1x64x4xbf16> to vector<64x4xbf16>
    %cst = arith.constant dense<0.000000e+00> : vector<64x2xf32>
    %6 = tpu.matmul %5, %0, %cst {dimension_numbers = #tpu.dot_dimension_numbers<[1], [0], [0], [1], [0, 0, 1, 1], [], []>} : vector<64x4xbf16>, vector<4x2xbf16>, vector<64x2xf32> -> vector<64x2xf32>
    %7 = vector.broadcast %2 : vector<1x2xf32> to vector<64x2xf32>
    %8 = arith.addf %6, %7 : vector<64x2xf32>
    %cst_11 = arith.constant dense<0.000000e+00> : vector<64x2xf32>
    %9 = tpu.matmul %5, %1, %cst_11 {dimension_numbers = #tpu.dot_dimension_numbers<[1], [0], [0], [1], [0, 0, 1, 1], [], []>} : vector<64x4xbf16>, vector<4x2xbf16>, vector<64x2xf32> -> vector<64x2xf32>
    %10 = vector.broadcast %3 : vector<1x2xf32> to vector<64x2xf32>
    %11 = arith.addf %9, %10 : vector<64x2xf32>
    %c0_12 = arith.constant 0 : index
    %c1 = arith.constant 1 : index
    %c0_13 = arith.constant 0 : index
    %c0_14 = arith.constant 0 : index
    %12 = vector.load %arg2[%c0_12, %c1, %c0_13, %c0_14] : memref<1x4x64x4xbf16, #tpu.memory_space<vmem>>, vector<1x1x64x4xbf16>
    %13 = vector.shape_cast %12 : vector<1x1x64x4xbf16> to vector<64x4xbf16>
    %cst_15 = arith.constant dense<0.000000e+00> : vector<64x2xf32>
    %14 = tpu.matmul %13, %0, %cst_15 {dimension_numbers = #tpu.dot_dimension_numbers<[1], [0], [0], [1], [0, 0, 1, 1], [], []>} : vector<64x4xbf16>, vector<4x2xbf16>, vector<64x2xf32> -> vector<64x2xf32>
    %15 = vector.broadcast %2 : vector<1x2xf32> to vector<64x2xf32>
    %16 = arith.addf %14, %15 : vector<64x2xf32>
    %cst_16 = arith.constant dense<0.000000e+00> : vector<64x2xf32>
    %17 = tpu.matmul %13, %1, %cst_16 {dimension_numbers = #tpu.dot_dimension_numbers<[1], [0], [0], [1], [0, 0, 1, 1], [], []>} : vector<64x4xbf16>, vector<4x2xbf16>, vector<64x2xf32> -> vector<64x2xf32>
    %18 = vector.broadcast %3 : vector<1x2xf32> to vector<64x2xf32>
    %19 = arith.addf %17, %18 : vector<64x2xf32>
    %20 = arith.maximumf %8, %16 : vector<64x2xf32>
    %21 = arith.maximumf %11, %19 : vector<64x2xf32>
    %c0_17 = arith.constant 0 : index
    %c2 = arith.constant 2 : index
    %c0_18 = arith.constant 0 : index
    %c0_19 = arith.constant 0 : index
    %22 = vector.load %arg2[%c0_17, %c2, %c0_18, %c0_19] : memref<1x4x64x4xbf16, #tpu.memory_space<vmem>>, vector<1x1x64x4xbf16>
    %23 = vector.shape_cast %22 : vector<1x1x64x4xbf16> to vector<64x4xbf16>
    %cst_20 = arith.constant dense<0.000000e+00> : vector<64x2xf32>
    %24 = tpu.matmul %23, %0, %cst_20 {dimension_numbers = #tpu.dot_dimension_numbers<[1], [0], [0], [1], [0, 0, 1, 1], [], []>} : vector<64x4xbf16>, vector<4x2xbf16>, vector<64x2xf32> -> vector<64x2xf32>
    %25 = vector.broadcast %2 : vector<1x2xf32> to vector<64x2xf32>
    %26 = arith.addf %24, %25 : vector<64x2xf32>
    %cst_21 = arith.constant dense<0.000000e+00> : vector<64x2xf32>
    %27 = tpu.matmul %23, %1, %cst_21 {dimension_numbers = #tpu.dot_dimension_numbers<[1], [0], [0], [1], [0, 0, 1, 1], [], []>} : vector<64x4xbf16>, vector<4x2xbf16>, vector<64x2xf32> -> vector<64x2xf32>
    %28 = vector.broadcast %3 : vector<1x2xf32> to vector<64x2xf32>
    %29 = arith.addf %27, %28 : vector<64x2xf32>
    %30 = arith.maximumf %20, %26 : vector<64x2xf32>
    %31 = arith.maximumf %21, %29 : vector<64x2xf32>
    %c0_22 = arith.constant 0 : index
    %c3 = arith.constant 3 : index
    %c0_23 = arith.constant 0 : index
    %c0_24 = arith.constant 0 : index
    %32 = vector.load %arg2[%c0_22, %c3, %c0_23, %c0_24] : memref<1x4x64x4xbf16, #tpu.memory_space<vmem>>, vector<1x1x64x4xbf16>
    %33 = vector.shape_cast %32 : vector<1x1x64x4xbf16> to vector<64x4xbf16>
    %cst_25 = arith.constant dense<0.000000e+00> : vector<64x2xf32>
    %34 = tpu.matmul %33, %0, %cst_25 {dimension_numbers = #tpu.dot_dimension_numbers<[1], [0], [0], [1], [0, 0, 1, 1], [], []>} : vector<64x4xbf16>, vector<4x2xbf16>, vector<64x2xf32> -> vector<64x2xf32>
    %35 = vector.broadcast %2 : vector<1x2xf32> to vector<64x2xf32>
    %36 = arith.addf %34, %35 : vector<64x2xf32>
    %cst_26 = arith.constant dense<0.000000e+00> : vector<64x2xf32>
    %37 = tpu.matmul %33, %1, %cst_26 {dimension_numbers = #tpu.dot_dimension_numbers<[1], [0], [0], [1], [0, 0, 1, 1], [], []>} : vector<64x4xbf16>, vector<4x2xbf16>, vector<64x2xf32> -> vector<64x2xf32>
    %38 = vector.broadcast %3 : vector<1x2xf32> to vector<64x2xf32>
    %39 = arith.addf %37, %38 : vector<64x2xf32>
    %40 = arith.maximumf %30, %36 : vector<64x2xf32>
    %41 = arith.maximumf %31, %39 : vector<64x2xf32>
    %42 = arith.truncf %40 : vector<64x2xf32> to vector<64x2xbf16>
    %c0_27 = arith.constant 0 : index
    %c0_28 = arith.constant 0 : index
    %c0_29 = arith.constant 0 : index
    %43 = vector.load %arg7[%c0_27, %c0_28, %c0_29] : memref<1x64x2xbf16, #tpu.memory_space<vmem>>, vector<1x64x2xbf16>
    %44 = vector.shape_cast %43 : vector<1x64x2xbf16> to vector<64x2xbf16>
    %45 = vector.shape_cast %42 : vector<64x2xbf16> to vector<1x64x2xbf16>
    tpu.vector_store %arg7[%c0_27, %c0_28, %c0_29], %45 {strides = array<i32>} : memref<1x64x2xbf16, #tpu.memory_space<vmem>>, vector<1x64x2xbf16>,
    %46 = arith.truncf %41 : vector<64x2xf32> to vector<64x2xbf16>
    %c0_30 = arith.constant 0 : index
    %c0_31 = arith.constant 0 : index
    %c0_32 = arith.constant 0 : index
    %47 = vector.load %arg8[%c0_30, %c0_31, %c0_32] : memref<1x64x2xbf16, #tpu.memory_space<vmem>>, vector<1x64x2xbf16>
    %48 = vector.shape_cast %47 : vector<1x64x2xbf16> to vector<64x2xbf16>
    %49 = vector.shape_cast %46 : vector<64x2xbf16> to vector<1x64x2xbf16>
    tpu.vector_store %arg8[%c0_30, %c0_31, %c0_32], %49 {strides = array<i32>} : memref<1x64x2xbf16, #tpu.memory_space<vmem>>, vector<1x64x2xbf16>,
    return
  }
  func.func @transform_0(%arg0: i32, %arg1: i32) -> (i32, i32, i32, i32) {
    %c0_i32 = arith.constant 0 : i32
    %c0_i32_0 = arith.constant 0 : i32
    %c0_i32_1 = arith.constant 0 : i32
    return %arg0, %c0_i32, %arg1, %c0_i32_0 : i32, i32, i32, i32
  }
  func.func @transform_1(%arg0: i32, %arg1: i32) -> (i32, i32) {
    %c0_i32 = arith.constant 0 : i32
    %c0_i32_0 = arith.constant 0 : i32
    %c0_i32_1 = arith.constant 0 : i32
    return %c0_i32, %c0_i32_0 : i32, i32
  }
  func.func @transform_2(%arg0: i32, %arg1: i32) -> (i32, i32) {
    %c0_i32 = arith.constant 0 : i32
    %c0_i32_0 = arith.constant 0 : i32
    %c0_i32_1 = arith.constant 0 : i32
    return %c0_i32, %c0_i32_0 : i32, i32
  }
  func.func @transform_3(%arg0: i32, %arg1: i32) -> (i32, i32) {
    %c0_i32 = arith.constant 0 : i32
    %c0_i32_0 = arith.constant 0 : i32
    %c0_i32_1 = arith.constant 0 : i32
    return %c0_i32, %c0_i32_0 : i32, i32
  }
  func.func @transform_4(%arg0: i32, %arg1: i32) -> (i32, i32) {
    %c0_i32 = arith.constant 0 : i32
    %c0_i32_0 = arith.constant 0 : i32
    %c0_i32_1 = arith.constant 0 : i32
    return %c0_i32, %c0_i32_0 : i32, i32
  }
  func.func @transform_5(%arg0: i32, %arg1: i32) -> (i32, i32, i32) {
    %c0_i32 = arith.constant 0 : i32
    %c0_i32_0 = arith.constant 0 : i32
    return %arg0, %arg1, %c0_i32 : i32, i32, i32
  }
  func.func @transform_6(%arg0: i32, %arg1: i32) -> (i32, i32, i32) {
    %c0_i32 = arith.constant 0 : i32
    %c0_i32_0 = arith.constant 0 : i32
    return %arg0, %arg1, %c0_i32 : i32, i32, i32
  }
}

</mosaic_0001>

<bundles_post_ra>
// kernel: tpu_custom_call.1
= control target key start
LH: loop header
LB: loop body
LE: loop exit
PB: predicated region body
PF: predicated region fallthrough
CT: control target
= control target key end

     0   :  { %s1638_s21 = smov 0   ;;  %s1640_s22 = smov 0   ;;  %s1944_s0 = inlined_call_operand.vmem [shape: bf16[2,4,64,4], index: 0, kind: input, shape index: {}]   ;;  %s1945_s1 = inlined_call_operand.vmem [shape: bf16[4,2], index: 1, kind: input, shape index: {}]   ;;  %s1946_s2 = inlined_call_operand.vmem [shape: f32[1,2], index: 2, kind: input, shape index: {}]   ;;  %s1947_s3 = inlined_call_operand.vmem [shape: bf16[4,2], index: 3, kind: input, shape index: {}]   ;;  %s1948_s4 = inlined_call_operand.vmem [shape: f32[1,2], index: 4, kind: input, shape index: {}]   ;;  %s1949_s5 = inlined_call_operand.vmem [shape: bf16[2,64,2], index: 5, kind: output, shape index: {0}]   ;;  %s1950_s6 = inlined_call_operand.vmem [shape: bf16[2,64,2], index: 6, kind: output, shape index: {1}]  }
   0x1   :  { %s1642_s23 = smov 0  }
   0x2 LB: > { %s29_s24 = sadd.s32 1, %s1597_s22  ;;  %p1293_p0 = scmp.ge.s32.totalorder %s1601_s23, 1  ;;  %s1601_s23 = sphi %s1642_s23, %s17_s23   ;;  %s1597_s22 = sphi %s1640_s22, %s1952_s22   ;;  %s1593_s21 = sphi %s1638_s21, %s1951_s21  }
   0x3   : > { %p31_p1 = scmp.ge.s32.totalorder %s29_s24, 2  ;;  %p238_p2 = scmp.lt.s32.totalorder %s1601_s23, 3 }
   0x5   : > { %s1954_s24 = smov (%p31_p1, %s29_s24), 0  ;;  %p239_p3 = pnand %p1293_p0, %p238_p2 }
   0x6   : > { %v316_v0 = vld [vmem:[%s1945_s1] sm:$0x3] (!%p239_p3)  ;;  %vm367_vm0 = vcmask (!%p239_p3), 1041408   ;;  %p286_p4 = scmp.lt.s32.totalorder (!%p239_p3), %s1593_s21, 1  ;;  %vm354_vm1 = vcmask (!%p239_p3), 31744   ;;  %vm1103_vm2 = vcmask (!%p239_p3), 11264  }
   0x7   : > { %242 = sbr.rel (%p239_p3) target bundleno = 297 (0x129), region = 40  ;;  %v317_v1 = vld [vmem:[%s1947_s3] sm:$0x3] (!%p239_p3)  ;;  %1531 = vmatprep.subr.msk.bf16.mxu0 (!%p239_p3), %vm367_vm0, %v316_v0  ;;  %v369_v2 = vsel (!%p239_p3), %vm367_vm0, %v316_v0, 0 }
   0x8   : > { %1532 = vmatprep.subr.msk.bf16.mxu1 (!%p239_p3), %vm367_vm0, %v317_v1  ;;  %v443_v3 = vsel (!%p239_p3), %vm367_vm0, %v317_v1, 0  ;;  %1452 = vmatpush3.bf16.msra.mxu0 (!%p239_p3), %v369_v2  ;;  %v1731_v36 = vld [vmem:[%s1946_s2] ss:$0 sm:$0xff] (!%p239_p3) }
   0x9   : > { %1462 = vmatpush3.bf16.msra.mxu1 (!%p239_p3), %v443_v3  ;;  %1533 = vmatprep.subr.msk.bf16.mxu0 (!%p239_p3), %vm367_vm0, %v316_v0  ;;  %v1736_v37 = vld [vmem:[%s1948_s4] ss:$0 sm:$0xff] (!%p239_p3) }
   0xa   : > { %1534 = vmatprep.subr.msk.bf16.mxu1 (!%p239_p3), %vm367_vm0, %v317_v1 }
   0xe   : > { %s1956_s21 = smov (!%p286_p4, %s1593_s21), 1 }
   0xf   : > { %s1392_s29 = sshll.u32 %s1956_s21, 7  ;;  %s1393_s13 = sshll.u32 %s1956_s21, 5 }
  0x10   : > { %s1674_s8 = scalar_lea.vmem %s1944_s0, %s1392_s29  ;;  %s1878_s16 = scalar_lea.vmem %s1949_s5, %s1393_s13 }
  0x11   : > { %v1563_v4 = vld [vmem:[%s1674_s8] sm:$0xff]   ;;  %v1564_v5 = vld [vmem:[%s1674_s8 + $0x8] sm:$0xff]   ;;  %v1565_v6 = vld [vmem:[%s1674_s8 + $0x10] sm:$0xff]   ;;  %s1883_s19 = scalar_lea.vmem %s1950_s6, %s1393_s13 }
  0x12   : > { %1453 = vmatprep.mubr.msk.bf16.mxu0 %vm354_vm1, %v1563_v4  ;;  %1463 = vmatprep.mubr.msk.bf16.mxu1 %vm354_vm1, %v1563_v4  ;;  %v1566_v7 = vld [vmem:[%s1674_s8 + $0x18] sm:$0xff]   ;;  %v1567_v8 = vld [vmem:[%s1674_s8 + $0x20] sm:$0xff]   ;;  %v1568_v9 = vld [vmem:[%s1674_s8 + $0x28] sm:$0xff]  }
  0x13   : > { %1454 = vmatmul.mubr.msk.bf16.vlgmr.msra.gmra.mrb[0].mxu0 %vm354_vm1, %v1564_v5  ;;  %1464 = vmatmul.mubr.msk.bf16.vlgmr.msra.gmra.mrb[0].mxu1 %vm354_vm1, %v1564_v5  ;;  %v1569_v10 = vld [vmem:[%s1674_s8 + $0x30] sm:$0xff]   ;;  %v1570_v11 = vld [vmem:[%s1674_s8 + $0x38] sm:$0xff]   ;;  %v1571_v12 = vld [vmem:[%s1674_s8 + $0x40] sm:$0xff]  }
  0x14   : > { %1472 = vmatpush3.bf16.msra.mxu0 %v369_v2  ;;  %1482 = vmatpush3.bf16.msra.mxu1 %v443_v3  ;;  %v1572_v13 = vld [vmem:[%s1674_s8 + $0x48] sm:$0xff]   ;;  %v1573_v14 = vld [vmem:[%s1674_s8 + $0x50] sm:$0xff]   ;;  %v1574_v15 = vld [vmem:[%s1674_s8 + $0x58] sm:$0xff]  }
  0x15   : > { %1457 = vmatprep.mubr.msk.bf16.mxu0 %vm354_vm1, %v1565_v6  ;;  %1467 = vmatprep.mubr.msk.bf16.mxu1 %vm354_vm1, %v1565_v6  ;;  %v1575_v16 = vld [vmem:[%s1674_s8 + $0x60] sm:$0xff]   ;;  %v1576_v17 = vld [vmem:[%s1674_s8 + $0x68] sm:$0xff]   ;;  %v1577_v18 = vld [vmem:[%s1674_s8 + $0x70] sm:$0xff]  }
  0x16   : > { %1535 = vmatprep.subr.msk.bf16.mxu0 %vm367_vm0, %v316_v0  ;;  %1536 = vmatprep.subr.msk.bf16.mxu1 %vm367_vm0, %v317_v1  ;;  %v1578_v19 = vld [vmem:[%s1674_s8 + $0x78] sm:$0xff]  }
  0x1b   : > { %1458 = vmatmul.mubr.msk.bf16.gmra.mrb[4].mxu0 %vm354_vm1, %v1566_v7  ;;  %1468 = vmatmul.mubr.msk.bf16.gmra.mrb[4].mxu1 %vm354_vm1, %v1566_v7 }
  0x1c   : > { %1473 = vmatprep.mubr.msk.bf16.mxu0 %vm354_vm1, %v1567_v8  ;;  %1483 = vmatprep.mubr.msk.bf16.mxu1 %vm354_vm1, %v1567_v8 }
  0x23   : > { %1474 = vmatmul.mubr.msk.bf16.vlgmr.msra.gmra.mrb[8].mxu0 %vm354_vm1, %v1568_v9  ;;  %1484 = vmatmul.mubr.msk.bf16.vlgmr.msra.gmra.mrb[8].mxu1 %vm354_vm1, %v1568_v9 }
  0x24   : > { %1492 = vmatpush3.bf16.msra.mxu0 %v369_v2  ;;  %1502 = vmatpush3.bf16.msra.mxu1 %v443_v3 }
  0x25   : > { %1477 = vmatprep.mubr.msk.bf16.mxu0 %vm354_vm1, %v1569_v10  ;;  %1487 = vmatprep.mubr.msk.bf16.mxu1 %vm354_vm1, %v1569_v10 }
  0x26   : > { %1537 = vmatprep.subr.msk.bf16.mxu0 %vm367_vm0, %v316_v0  ;;  %1538 = vmatprep.subr.msk.bf16.mxu1 %vm367_vm0, %v317_v1 }
  0x2b   : > { %1478 = vmatmul.mubr.msk.bf16.gmra.mrb[12].mxu0 %vm354_vm1, %v1570_v11  ;;  %1488 = vmatmul.mubr.msk.bf16.gmra.mrb[12].mxu1 %vm354_vm1, %v1570_v11 }
  0x2c   : > { %1493 = vmatprep.mubr.msk.bf16.mxu0 %vm354_vm1, %v1571_v12  ;;  %1503 = vmatprep.mubr.msk.bf16.mxu1 %vm354_vm1, %v1571_v12 }
  0x33   : > { %1494 = vmatmul.mubr.msk.bf16.vlgmr.msra.gmra.mrb[16].mxu0 %vm354_vm1, %v1572_v13  ;;  %1504 = vmatmul.mubr.msk.bf16.vlgmr.msra.gmra.mrb[16].mxu1 %vm354_vm1, %v1572_v13 }
  0x34   : > { %1512 = vmatpush3.bf16.msra.mxu0 %v369_v2  ;;  %1522 = vmatpush3.bf16.msra.mxu1 %v443_v3 }
  0x35   : > { %1497 = vmatprep.mubr.msk.bf16.mxu0 %vm354_vm1, %v1573_v14  ;;  %1507 = vmatprep.mubr.msk.bf16.mxu1 %vm354_vm1, %v1573_v14 }
  0x3b   : > { %1498 = vmatmul.mubr.msk.bf16.gmra.mrb[20].mxu0 %vm354_vm1, %v1574_v15  ;;  %1508 = vmatmul.mubr.msk.bf16.gmra.mrb[20].mxu1 %vm354_vm1, %v1574_v15 }
  0x3c   : > { %1513 = vmatprep.mubr.msk.bf16.mxu0 %vm354_vm1, %v1575_v16  ;;  %1523 = vmatprep.mubr.msk.bf16.mxu1 %vm354_vm1, %v1575_v16 }
  0x43   : > { %1514 = vmatmul.mubr.msk.bf16.vlgmr.msra.gmra.mrb[24].mxu0 %vm354_vm1, %v1576_v17  ;;  %1524 = vmatmul.mubr.msk.bf16.vlgmr.msra.gmra.mrb[24].mxu1 %vm354_vm1, %v1576_v17 }
  0x44   : > { %1517 = vmatprep.mubr.msk.bf16.mxu0 %vm354_vm1, %v1577_v18  ;;  %1527 = vmatprep.mubr.msk.bf16.mxu1 %vm354_vm1, %v1577_v18 }
  0x4b   : > { %1518 = vmatmul.mubr.msk.bf16.gmra.mrb[28].mxu0 %vm354_vm1, %v1578_v19  ;;  %1528 = vmatmul.mubr.msk.bf16.gmra.mrb[28].mxu1 %vm354_vm1, %v1578_v19 }
  0xe6   : > { %v1455_v20 = vpop.f32.mrb[0].mxu0  ;;  %v1465_v21 = vpop.f32.mrb[0].mxu1 }
  0xe7   : > { %v405_v22 = vpop.f32.mrb[1].mxu0  ;;  %v479_v23 = vpop.f32.mrb[1].mxu1  ;;  %v1739_v38 = vadd.f32 %v1455_v20, %v1731_v36  ;;  %v1742_v39 = vadd.f32 %v1465_v21, %v1736_v37 }
  0xe8   : > { %v1456_v24 = vpop.f32.mrb[2].mxu0  ;;  %v1466_v25 = vpop.f32.mrb[2].mxu1  ;;  %v1745_v40 = vadd.f32 %v1731_v36, %v405_v22  ;;  %v1748_v41 = vadd.f32 %v1736_v37, %v479_v23 }
  0xe9   : > { %v408_v26 = vpop.f32.mrb[3].mxu0  ;;  %v482_v27 = vpop.f32.mrb[3].mxu1  ;;  %v1751_v44 = vadd.f32 %v1456_v24, %v1731_v36  ;;  %v1754_v45 = vadd.f32 %v1466_v25, %v1736_v37 }
  0xea   : > { %v1763_v50 = vadd.f32 %v1731_v36, %v408_v26  ;;  %v1766_v51 = vadd.f32 %v1736_v37, %v482_v27 }
  0xee   : > { %v1459_v28 = vpop.f32.mrb[4].mxu0  ;;  %v1469_v29 = vpop.f32.mrb[4].mxu1 }
  0xef   : > { %v421_v30 = vpop.f32.mrb[5].mxu0  ;;  %v495_v31 = vpop.f32.mrb[5].mxu1  ;;  %v1797_v6 = vadd.f32 %v1459_v28, %v1731_v36  ;;  %v1800_v7 = vadd.f32 %v1469_v29, %v1736_v37 }
  0xf0   : > { %v1460_v32 = vpop.f32.mrb[6].mxu0  ;;  %v1470_v33 = vpop.f32.mrb[6].mxu1  ;;  %v1803_v8 = vadd.f32 %v1731_v36, %v421_v30  ;;  %v1806_v9 = vadd.f32 %v1736_v37, %v495_v31 }
  0xf1   : > { %v424_v34 = vpop.f32.mrb[7].mxu0  ;;  %v498_v35 = vpop.f32.mrb[7].mxu1  ;;  %v1809_v12 = vadd.f32 %v1460_v32, %v1731_v36  ;;  %v1812_v13 = vadd.f32 %v1470_v33, %v1736_v37 }
  0xf2   : > { %v1817_v18 = vadd.f32 %v1731_v36, %v424_v34  ;;  %v1820_v19 = vadd.f32 %v1736_v37, %v498_v35 }
  0xf6   : > { %v1475_v42 = vpop.f32.mrb[8].mxu0  ;;  %v1485_v43 = vpop.f32.mrb[8].mxu1 }
  0xf7   : > { %v1757_v46 = vadd.f32 %v1475_v42, %v1731_v36  ;;  %v1760_v47 = vadd.f32 %v1485_v43, %v1736_v37  ;;  %v585_v48 = vpop.f32.mrb[9].mxu0  ;;  %v650_v49 = vpop.f32.mrb[9].mxu1 }
  0xf8   : > { %v1769_v52 = vadd.f32 %v1731_v36, %v585_v48  ;;  %v1772_v53 = vadd.f32 %v1736_v37, %v650_v49  ;;  %v1476_v54 = vpop.f32.mrb[10].mxu0  ;;  %v1486_v55 = vpop.f32.mrb[10].mxu1 }
  0xf9   : > { %v683_v56 = vmax.f32 %v1739_v38, %v1757_v46  ;;  %v691_v57 = vmax.f32 %v1742_v39, %v1760_v47  ;;  %v1779_v58 = vadd.f32 %v1476_v54, %v1731_v36  ;;  %v1782_v59 = vadd.f32 %v1486_v55, %v1736_v37  ;;  %v588_v60 = vpop.f32.mrb[11].mxu0  ;;  %v653_v61 = vpop.f32.mrb[11].mxu1 }
  0xfa   : > { %v681_v62 = vmax.f32 %v1745_v40, %v1769_v52  ;;  %v689_v63 = vmax.f32 %v1748_v41, %v1772_v53  ;;  %v589_v0 = vadd.f32 %v1731_v36, %v588_v60  ;;  %v654_v1 = vadd.f32 %v1736_v37, %v653_v61 }
  0xfb   : > { %v684_v2 = vmax.f32 %v1751_v44, %v1779_v58  ;;  %v692_v3 = vmax.f32 %v1754_v45, %v1782_v59 }
  0xfc   : > { %v682_v4 = vmax.f32 %v1763_v50, %v589_v0  ;;  %v690_v5 = vmax.f32 %v1766_v51, %v654_v1 }
  0xfe   : > { %v1479_v10 = vpop.f32.mrb[12].mxu0  ;;  %v1489_v11 = vpop.f32.mrb[12].mxu1 }
  0xff   : > { %v610_v14 = vadd.f32 %v1479_v10, %v1731_v36  ;;  %v675_v15 = vadd.f32 %v1489_v11, %v1736_v37  ;;  %v601_v16 = vpop.f32.mrb[13].mxu0  ;;  %v666_v17 = vpop.f32.mrb[13].mxu1 }
 0x100   : > { %v602_v20 = vadd.f32 %v1731_v36, %v601_v16  ;;  %v667_v21 = vadd.f32 %v1736_v37, %v666_v17  ;;  %v1480_v22 = vpop.f32.mrb[14].mxu0  ;;  %v1490_v23 = vpop.f32.mrb[14].mxu1 }
 0x101   : > { %v687_v24 = vmax.f32 %v1797_v6, %v610_v14  ;;  %v695_v25 = vmax.f32 %v1800_v7, %v675_v15  ;;  %v613_v26 = vadd.f32 %v1480_v22, %v1731_v36  ;;  %v678_v27 = vadd.f32 %v1490_v23, %v1736_v37  ;;  %v604_v28 = vpop.f32.mrb[15].mxu0  ;;  %v669_v29 = vpop.f32.mrb[15].mxu1 }
 0x102   : > { %v685_v30 = vmax.f32 %v1803_v8, %v602_v20  ;;  %v693_v31 = vmax.f32 %v1806_v9, %v667_v21  ;;  %v605_v32 = vadd.f32 %v1731_v36, %v604_v28  ;;  %v670_v33 = vadd.f32 %v1736_v37, %v669_v29 }
 0x103   : > { %v688_v34 = vmax.f32 %v1809_v12, %v613_v26  ;;  %v696_v35 = vmax.f32 %v1812_v13, %v678_v27 }
 0x104   : > { %v686_v38 = vmax.f32 %v1817_v18, %v605_v32  ;;  %v694_v39 = vmax.f32 %v1820_v19, %v670_v33 }
 0x106   : > { %v1495_v40 = vpop.f32.mrb[16].mxu0  ;;  %v1505_v41 = vpop.f32.mrb[16].mxu1 }
 0x107   : > { %v781_v42 = vadd.f32 %v1495_v40, %v1731_v36  ;;  %v846_v43 = vadd.f32 %v1505_v41, %v1736_v37  ;;  %v772_v44 = vpop.f32.mrb[17].mxu0  ;;  %v837_v45 = vpop.f32.mrb[17].mxu1 }
 0x108   : > { %v773_v46 = vadd.f32 %v1731_v36, %v772_v44  ;;  %v838_v47 = vadd.f32 %v1736_v37, %v837_v45  ;;  %v1496_v48 = vpop.f32.mrb[18].mxu0  ;;  %v1506_v49 = vpop.f32.mrb[18].mxu1 }
 0x109   : > { %v870_v50 = vmax.f32 %v683_v56, %v781_v42  ;;  %v878_v51 = vmax.f32 %v691_v57, %v846_v43  ;;  %v784_v52 = vadd.f32 %v1496_v48, %v1731_v36  ;;  %v849_v53 = vadd.f32 %v1506_v49, %v1736_v37  ;;  %v775_v54 = vpop.f32.mrb[19].mxu0  ;;  %v840_v55 = vpop.f32.mrb[19].mxu1 }
 0x10a   : > { %v868_v58 = vmax.f32 %v681_v62, %v773_v46  ;;  %v876_v59 = vmax.f32 %v689_v63, %v838_v47  ;;  %v776_v60 = vadd.f32 %v1731_v36, %v775_v54  ;;  %v841_v61 = vadd.f32 %v1736_v37, %v840_v55 }
 0x10b   : > { %v871_v0 = vmax.f32 %v684_v2, %v784_v52  ;;  %v879_v1 = vmax.f32 %v692_v3, %v849_v53 }
 0x10c   : > { %v869_v6 = vmax.f32 %v682_v4, %v776_v60  ;;  %v877_v7 = vmax.f32 %v690_v5, %v841_v61 }
 0x10e   : > { %v1499_v8 = vpop.f32.mrb[20].mxu0  ;;  %v1509_v9 = vpop.f32.mrb[20].mxu1 }
 0x10f   : > { %v797_v56 = vadd.f32 %v1499_v8, %v1731_v36  ;;  %v862_v57 = vadd.f32 %v1509_v9, %v1736_v37  ;;  %v788_v10 = vpop.f32.mrb[21].mxu0  ;;  %v853_v11 = vpop.f32.mrb[21].mxu1 }
 0x110   : > { %v789_v12 = vadd.f32 %v1731_v36, %v788_v10  ;;  %v854_v62 = vadd.f32 %v1736_v37, %v853_v11  ;;  %v1500_v63 = vpop.f32.mrb[22].mxu0  ;;  %v1510_v13 = vpop.f32.mrb[22].mxu1 }
 0x111   : > { %v1848_v14 = vmax.f32 %v687_v24, %v797_v56  ;;  %v1850_v2 = vmax.f32 %v695_v25, %v862_v57  ;;  %v800_v3 = vadd.f32 %v1500_v63, %v1731_v36  ;;  %v865_v4 = vadd.f32 %v1510_v13, %v1736_v37  ;;  %v791_v5 = vpop.f32.mrb[23].mxu0  ;;  %v856_v15 = vpop.f32.mrb[23].mxu1 }
 0x112   : > { %v1854_v16 = vmax.f32 %v685_v30, %v789_v12  ;;  %v1856_v17 = vmax.f32 %v693_v31, %v854_v62  ;;  %v792_v18 = vadd.f32 %v1731_v36, %v791_v5  ;;  %v857_v19 = vadd.f32 %v1736_v37, %v856_v15 }
 0x113   : > { %v1860_v20 = vmax.f32 %v688_v34, %v800_v3  ;;  %v1862_v21 = vmax.f32 %v696_v35, %v865_v4 }
 0x114   : > { %v1864_v22 = vmax.f32 %v686_v38, %v792_v18  ;;  %v1866_v23 = vmax.f32 %v694_v39, %v857_v19 }
 0x116   : > { %v1515_v24 = vpop.f32.mrb[24].mxu0  ;;  %v1525_v25 = vpop.f32.mrb[24].mxu1 }
 0x117   : > { %v968_v26 = vadd.f32 %v1515_v24, %v1731_v36  ;;  %v1033_v27 = vadd.f32 %v1525_v25, %v1736_v37  ;;  %v959_v28 = vpop.f32.mrb[25].mxu0  ;;  %v1024_v29 = vpop.f32.mrb[25].mxu1 }
 0x118   : > { %v960_v30 = vadd.f32 %v1731_v36, %v959_v28  ;;  %v1025_v31 = vadd.f32 %v1736_v37, %v1024_v29  ;;  %v1516_v32 = vpop.f32.mrb[26].mxu0  ;;  %v1526_v33 = vpop.f32.mrb[26].mxu1 }
 0x119   : > { %v1057_v34 = vmax.f32 %v870_v50, %v968_v26  ;;  %v1065_v35 = vmax.f32 %v878_v51, %v1033_v27  ;;  %v971_v38 = vadd.f32 %v1516_v32, %v1731_v36  ;;  %v1036_v39 = vadd.f32 %v1526_v33, %v1736_v37  ;;  %v962_v40 = vpop.f32.mrb[27].mxu0  ;;  %v1027_v41 = vpop.f32.mrb[27].mxu1 }
 0x11a   : > { %v1055_v42 = vmax.f32 %v868_v58, %v960_v30  ;;  %v1063_v43 = vmax.f32 %v876_v59, %v1025_v31  ;;  %v963_v44 = vadd.f32 %v1731_v36, %v962_v40  ;;  %v1028_v45 = vadd.f32 %v1736_v37, %v1027_v41 }
 0x11b   : > { %v1397_v46 = vpack.c.bf16 %v1057_v34, %v1057_v34  ;;  %v1405_v47 = vpack.c.bf16 %v1065_v35, %v1065_v35  ;;  %v1058_v48 = vmax.f32 %v871_v0, %v971_v38  ;;  %v1066_v49 = vmax.f32 %v879_v1, %v1036_v39 }
 0x11c   : > { %v1395_v50 = vpack.c.bf16 %v1055_v42, %v1055_v42  ;;  %v1403_v51 = vpack.c.bf16 %v1063_v43, %v1063_v43  ;;  %v1056_v52 = vmax.f32 %v869_v6, %v963_v44  ;;  %v1064_v53 = vmax.f32 %v877_v7, %v1028_v45 }
 0x11d   : > { %1106 = vst.msk [vmem:[%s1878_s16 + $0x8] sm:$0xf] %vm1103_vm2, %v1397_v46  ;;  %1146 = vst.msk [vmem:[%s1883_s19 + $0x8] sm:$0xf] %vm1103_vm2, %v1405_v47  ;;  %v1398_v54 = vpack.c.bf16 %v1058_v48, %v1058_v48  ;;  %v1406_v55 = vpack.c.bf16 %v1066_v49, %v1066_v49 }
 0x11e   : > { %1104 = vst.msk [vmem:[%s1878_s16] sm:$0xf] %vm1103_vm2, %v1395_v50  ;;  %1144 = vst.msk [vmem:[%s1883_s19] sm:$0xf] %vm1103_vm2, %v1403_v51  ;;  %v1396_v58 = vpack.c.bf16 %v1056_v52, %v1056_v52  ;;  %v1404_v59 = vpack.c.bf16 %v1064_v53, %v1064_v53  ;;  %v1519_v60 = vpop.f32.mrb[28].mxu0  ;;  %v1529_v61 = vpop.f32.mrb[28].mxu1 }
 0x11f   : > { %1107 = vst.msk [vmem:[%s1878_s16 + $0xc] sm:$0xf] %vm1103_vm2, %v1398_v54  ;;  %1147 = vst.msk [vmem:[%s1883_s19 + $0xc] sm:$0xf] %vm1103_vm2, %v1406_v55  ;;  %v984_v0 = vadd.f32 %v1519_v60, %v1731_v36  ;;  %v1049_v1 = vadd.f32 %v1529_v61, %v1736_v37  ;;  %v975_v6 = vpop.f32.mrb[29].mxu0  ;;  %v1040_v7 = vpop.f32.mrb[29].mxu1 }
 0x120   : > { %1105 = vst.msk [vmem:[%s1878_s16 + $0x4] sm:$0xf] %vm1103_vm2, %v1396_v58  ;;  %1145 = vst.msk [vmem:[%s1883_s19 + $0x4] sm:$0xf] %vm1103_vm2, %v1404_v59  ;;  %v976_v8 = vadd.f32 %v1731_v36, %v975_v6  ;;  %v1041_v9 = vadd.f32 %v1736_v37, %v1040_v7  ;;  %v1520_v56 = vpop.f32.mrb[30].mxu0  ;;  %v1530_v57 = vpop.f32.mrb[30].mxu1 }
 0x121   : > { %v1061_v10 = vmax.f32 %v1848_v14, %v984_v0  ;;  %v1069_v11 = vmax.f32 %v1850_v2, %v1049_v1  ;;  %v987_v12 = vadd.f32 %v1520_v56, %v1731_v36  ;;  %v1052_v62 = vadd.f32 %v1530_v57, %v1736_v37  ;;  %v978_v63 = vpop.f32.mrb[31].mxu0  ;;  %v1043_v13 = vpop.f32.mrb[31].mxu1 }
 0x122   : > { %v1059_v3 = vmax.f32 %v1854_v16, %v976_v8  ;;  %v1067_v4 = vmax.f32 %v1856_v17, %v1041_v9  ;;  %v979_v5 = vadd.f32 %v1731_v36, %v978_v63  ;;  %v1044_v14 = vadd.f32 %v1736_v37, %v1043_v13 }
 0x123   : > { %v1401_v15 = vpack.c.bf16 %v1061_v10, %v1061_v10  ;;  %v1409_v2 = vpack.c.bf16 %v1069_v11, %v1069_v11  ;;  %v1062_v18 = vmax.f32 %v1860_v20, %v987_v12  ;;  %v1070_v19 = vmax.f32 %v1862_v21, %v1052_v62 }
 0x124   : > { %v1399_v24 = vpack.c.bf16 %v1059_v3, %v1059_v3  ;;  %v1407_v16 = vpack.c.bf16 %v1067_v4, %v1067_v4  ;;  %v1060_v25 = vmax.f32 %v1864_v22, %v979_v5  ;;  %v1068_v17 = vmax.f32 %v1866_v23, %v1044_v14 }
 0x125   : > { %1110 = vst.msk [vmem:[%s1878_s16 + $0x18] sm:$0xf] %vm1103_vm2, %v1401_v15  ;;  %1150 = vst.msk [vmem:[%s1883_s19 + $0x18] sm:$0xf] %vm1103_vm2, %v1409_v2  ;;  %v1402_v36 = vpack.c.bf16 %v1062_v18, %v1062_v18  ;;  %v1410_v37 = vpack.c.bf16 %v1070_v19, %v1070_v19 }
 0x126   : > { %1108 = vst.msk [vmem:[%s1878_s16 + $0x10] sm:$0xf] %vm1103_vm2, %v1399_v24  ;;  %1148 = vst.msk [vmem:[%s1883_s19 + $0x10] sm:$0xf] %vm1103_vm2, %v1407_v16  ;;  %v1400_v20 = vpack.c.bf16 %v1060_v25, %v1060_v25  ;;  %v1408_v26 = vpack.c.bf16 %v1068_v17, %v1068_v17 }
 0x127   : > { %1111 = vst.msk [vmem:[%s1878_s16 + $0x1c] sm:$0xf] %vm1103_vm2, %v1402_v36  ;;  %1151 = vst.msk [vmem:[%s1883_s19 + $0x1c] sm:$0xf] %vm1103_vm2, %v1410_v37 }
 0x128   : > { %1109 = vst.msk [vmem:[%s1878_s16 + $0x14] sm:$0xf] %vm1103_vm2, %v1400_v20  ;;  %1149 = vst.msk [vmem:[%s1883_s19 + $0x14] sm:$0xf] %vm1103_vm2, %v1408_v26 }
 0x129 PF: > { %s17_s23 = sadd.s32 1, %s1601_s23   ;;  %s1951_s21 = smov %s1597_s22 }
 0x12a   : > { %p14_p5 = scmp.ge.s32.totalorder %s17_s23, 4   ;;  %s1952_s22 = smov %s1954_s24 }
 0x12c   :  { %16 = sbr.rel (!%p14_p5) target bundleno = 2 (0x2), region = 85 }

</bundles_post_ra>
